<compile_context>
chip_gen: v6e
topology: v6e:2x2x1
jax: 0.10.0
libtpu: 0.0.40
codegen_flags: <defaults>
</compile_context>

<pallas_src>
import functools

import jax
import jax.numpy as jnp
from jax.experimental import pallas as pl
from jax.experimental.pallas import tpu as pltpu

_MIB = 1024 * 1024


# ---------------------------------------------------------------------------
# Kernels
# ---------------------------------------------------------------------------
def se_fused_kernel(x_ref, w1_ref, w2_ref, o_ref, *, inv_hw):
    """Fused squeeze -> excite -> scale on a (Bb, C, HW) block."""
    x = x_ref[...]                                                    # (Bb, C, HW)
    xf = x if x.dtype == jnp.float32 else x.astype(jnp.float32)
    # squeeze: global average pool over the spatial (lane) axis
    y = jnp.sum(xf, axis=-1) * inv_hw                                 # (Bb, C) f32
    # excitation: fc1 -> ReLU -> fc2 -> sigmoid, f32 MXU accumulation
    h = jnp.dot(y, w1_ref[...], preferred_element_type=jnp.float32)   # (Bb, Cr)
    h = jnp.maximum(h, 0.0)
    s = jnp.dot(h, w2_ref[...], preferred_element_type=jnp.float32)   # (Bb, C)
    s = jax.nn.sigmoid(s)
    # scale: broadcast per-(batch, channel) gate over spatial positions
    o_ref[...] = x * s[:, :, None].astype(x.dtype)


def se_gate_kernel(x_ref, w1_ref, w2_ref, s_ref, acc_ref, *, inv_hw, hw, hw_chunk):
    """Chunked-pool pass: accumulate the spatial sum; emit the gate at the last chunk."""
    h_idx = pl.program_id(1)

    @pl.when(h_idx == 0)
    def _():
        acc_ref[...] = jnp.zeros_like(acc_ref)

    x = x_ref[...]                                                    # (1, C, HWc)
    xf = x if x.dtype == jnp.float32 else x.astype(jnp.float32)
    if hw % hw_chunk != 0:
        # Last chunk is partial: zero out-of-range spatial lanes before summing.
        lane = jax.lax.broadcasted_iota(jnp.int32, xf.shape, 2)
        xf = jnp.where(h_idx * hw_chunk + lane < hw, xf, 0.0)
    acc_ref[...] += jnp.sum(xf, axis=-1)                              # (1, C) f32

    @pl.when(h_idx == pl.num_programs(1) - 1)
    def _():
        y = acc_ref[...] * inv_hw                                     # (1, C)
        h = jnp.maximum(
            jnp.dot(y, w1_ref[...], preferred_element_type=jnp.float32), 0.0)
        s = jax.nn.sigmoid(
            jnp.dot(h, w2_ref[...], preferred_element_type=jnp.float32))
        s_ref[...] = s[:, None, :].astype(s_ref.dtype)                # (1, 1, C)


def se_scale_kernel(x_ref, s_ref, o_ref):
    """Chunked-scale pass: multiply each spatial chunk by the precomputed gate."""
    x = x_ref[...]                                                    # (1, C, HWc)
    gate = s_ref[0, 0, :][None, :, None].astype(x.dtype)              # (1, C, 1)
    o_ref[...] = x * gate


# ---------------------------------------------------------------------------
# Block / VMEM planning (generation-aware)
# ---------------------------------------------------------------------------
def _tpu_memory_plan():
    """Return (data_budget_bytes, vmem_limit_bytes, n_tensorcores)."""
    try:
        vmem_cap = int(pltpu.get_tpu_info().vmem_capacity_bytes)
    except Exception:
        vmem_cap = 64 * _MIB  # conservative default
    if vmem_cap <= 96 * _MIB:
        # v7x-like: 64 MiB VMEM per TensorCore, 2 TensorCores per chip.
        return 40 * _MIB, 48 * _MIB, 2
    # v5e / v6e: 128 MiB VMEM, single TensorCore.
    return 80 * _MIB, 100 * _MIB, 1


def _choose_block_batch(B, C, HW, itemsize, budget, n_cores):
    """Batch rows per grid step for the fused path; None -> chunked fallback."""
    per_row = 4 * C * HW * itemsize          # double-buffered input + output block
    if per_row > budget:
        return None
    max_bb = max(1, budget // per_row)
    if n_cores == 1:
        # Single TensorCore: extra grid steps only add ~0.35 us overhead each.
        bb = min(B, max_bb)
    else:
        # >= 2 grid steps per core so the output DMA of step i overlaps the
        # input DMA of step i+1, but never shrink blocks below ~1 MiB.
        steps = min(B, 2 * n_cores)
        bb = max(1, B // steps)
        min_bb = max(1, -(-_MIB // (C * HW * itemsize)))
        bb = max(bb, min_bb)
        bb = min(bb, max_bb, B)
    return int(bb)


def _choose_hw_chunk(C, HW, itemsize, budget):
    hwc = (budget // (4 * C * itemsize)) // 128 * 128
    hwc = max(128, int(hwc))
    return int(min(hwc, HW))


# ---------------------------------------------------------------------------
# Wrapper
# ---------------------------------------------------------------------------
@functools.partial(jax.jit, static_argnames=("block_bytes_override",))
def se_layer(x, w1, w2, *, block_bytes_override=None):
    """SELayer forward.

    x : (B, C, H, W)
    w1: fc1.weight.T, shape (C, C // reduction)
    w2: fc2.weight.T, shape (C // reduction, C)
    """
    B, C, H, W = x.shape
    HW = H * W
    Cr = w1.shape[1]
    itemsize = x.dtype.itemsize

    budget, vmem_limit, n_cores = _tpu_memory_plan()
    if block_bytes_override is not None:
        budget = int(block_bytes_override)

    x_flat = x.reshape(B, C, HW)
    bb = _choose_block_batch(B, C, HW, itemsize, budget, n_cores)

    w_bytes = (w1.size + w2.size) * w1.dtype.itemsize
    mm_flops = 4 * B * C * Cr

    if bb is not None:
        # ---- fused single-pass kernel: x read and written exactly once ----
        grid = (pl.cdiv(B, bb),)
        cost = pl.CostEstimate(
            flops=int(mm_flops + 2 * B * C * HW),           # pool add + scale mul
            transcendentals=int(2 * B * C),                 # sigmoid ~ exp + recip
            bytes_accessed=int(2 * B * C * HW * itemsize + w_bytes),
        )
        out_flat = pl.pallas_call(
            functools.partial(se_fused_kernel, inv_hw=1.0 / HW),
            out_shape=jax.ShapeDtypeStruct((B, C, HW), x.dtype),
            grid_spec=pltpu.PrefetchScalarGridSpec(
                num_scalar_prefetch=0,
                grid=grid,
                in_specs=[
                    # Last two block dims equal the full array dims -> no padding,
                    # masked stores only on the unaligned lane tail.
                    pl.BlockSpec((bb, C, HW), lambda b: (b, 0, 0)),
                    pl.BlockSpec((C, Cr), lambda b: (0, 0)),   # VMEM-resident weights
                    pl.BlockSpec((Cr, C), lambda b: (0, 0)),
                ],
                out_specs=pl.BlockSpec((bb, C, HW), lambda b: (b, 0, 0)),
            ),
            compiler_params=pltpu.CompilerParams(
                dimension_semantics=("parallel",),
                vmem_limit_bytes=vmem_limit,
            ),
            cost_estimate=cost,
        )(x_flat, w1, w2)
        return out_flat.reshape(B, C, H, W)

    # ---- chunked fallback: one (C, HW) row does not fit the VMEM budget ----
    # Pass 1: stream spatial chunks, accumulate pool in scratch, emit gate.
    # Pass 2: stream x again and apply the gate (x is read twice, unavoidable).
    hwc = _choose_hw_chunk(C, HW, itemsize, budget)
    n_hw = pl.cdiv(HW, hwc)

    gate = pl.pallas_call(
        functools.partial(se_gate_kernel, inv_hw=1.0 / HW, hw=HW, hw_chunk=hwc),
        out_shape=jax.ShapeDtypeStruct((B, 1, C), jnp.float32),
        grid_spec=pltpu.PrefetchScalarGridSpec(
            num_scalar_prefetch=0,
            grid=(B, n_hw),
            in_specs=[
                pl.BlockSpec((1, C, hwc), lambda b, h: (b, 0, h)),
                pl.BlockSpec((C, Cr), lambda b, h: (0, 0)),
                pl.BlockSpec((Cr, C), lambda b, h: (0, 0)),
            ],
            out_specs=pl.BlockSpec((1, 1, C), lambda b, h: (b, 0, 0)),
            scratch_shapes=[pltpu.VMEM((1, C), jnp.float32)],
        ),
        compiler_params=pltpu.CompilerParams(
            dimension_semantics=("parallel", "arbitrary"),
            vmem_limit_bytes=vmem_limit,
        ),
        cost_estimate=pl.CostEstimate(
            flops=int(mm_flops + B * C * HW),
            transcendentals=int(2 * B * C),
            bytes_accessed=int(B * C * HW * itemsize + w_bytes + B * C * 4),
        ),
    )(x_flat, w1, w2)

    out_flat = pl.pallas_call(
        se_scale_kernel,
        out_shape=jax.ShapeDtypeStruct((B, C, HW), x.dtype),
        grid_spec=pltpu.PrefetchScalarGridSpec(
            num_scalar_prefetch=0,
            grid=(B, n_hw),
            in_specs=[
                pl.BlockSpec((1, C, hwc), lambda b, h: (b, 0, h)),
                pl.BlockSpec((1, 1, C), lambda b, h: (b, 0, 0)),
            ],
            out_specs=pl.BlockSpec((1, C, hwc), lambda b, h: (b, 0, h)),
        ),
        compiler_params=pltpu.CompilerParams(
            dimension_semantics=("parallel", "parallel"),
            vmem_limit_bytes=vmem_limit,
        ),
        cost_estimate=pl.CostEstimate(
            flops=int(B * C * HW),
            transcendentals=0,
            bytes_accessed=int(2 * B * C * HW * itemsize + B * C * 4),
        ),
    )(x_flat, gate)
    return out_flat.reshape(B, C, H, W)


# ---------------------------------------------------------------------------
# Reference + test harness
# ---------------------------------------------------------------------------
def se_reference(x, w1, w2):
    y = jnp.mean(x, axis=(2, 3))                    # (B, C)
    h = jnp.maximum(y @ w1, 0.0)                    # (B, C//r)
    s = jax.nn.sigmoid(h @ w2)                      # (B, C)
    return x * s[:, :, None, None]


def _make_inputs(key, B, C, H, W, reduction):
    Cr = max(1, C // reduction)
    kx, k1, k2 = jax.random.split(key, 3)
    x = jax.random.normal(kx, (B, C, H, W), dtype=jnp.float32)
    bound1 = 1.0 / (C ** 0.5)
    bound2 = 1.0 / (Cr ** 0.5)
    w1 = jax.random.uniform(k1, (C, Cr), jnp.float32, -bound1, bound1)  # fc1.weight.T
    w2 = jax.random.uniform(k2, (Cr, C), jnp.float32, -bound2, bound2)  # fc2.weight.T
    return x, w1, w2


if __name__ == "__main__":
    key = jax.random.PRNGKey(0)
    k_a, k_b, k_c = jax.random.split(key, 3)

    # Case 1: shapes implied by the module (channel=64, reduction=16), HW=256
    # is 128-aligned -> fully unmasked lane-dense stores on the fused path.
    x, w1, w2 = _make_inputs(k_a, B=2, C=64, H=16, W=16, reduction=16)
    out = se_layer(x, w1, w2)
    jax.block_until_ready(out)
    ref = se_reference(x, w1, w2)
    assert out.shape == x.shape and out.dtype == x.dtype
    assert jnp.allclose(out, ref, atol=1e-5, rtol=1e-5)

    # Case 2: unaligned spatial (7x7=49) now runs with zero padding / slicing
    # (block last dim == full HW, masked store tail only).
    x2, w1b, w2b = _make_inputs(k_b, B=4, C=32, H=7, W=7, reduction=16)
    out2 = se_layer(x2, w1b, w2b)
    jax.block_until_ready(out2)
    ref2 = se_reference(x2, w1b, w2b)
    assert out2.shape == x2.shape and out2.dtype == x2.dtype
    assert jnp.allclose(out2, ref2, atol=1e-5, rtol=1e-5)

    # Case 3: force the chunked (pool-pass + scale-pass) fallback via a tiny
    # block-byte override, with a partial last spatial chunk (13x13=169).
    x3, w1c, w2c = _make_inputs(k_c, B=2, C=32, H=13, W=13, reduction=8)
    out3 = se_layer(x3, w1c, w2c, block_bytes_override=64 * 1024)
    jax.block_until_ready(out3)
    ref3 = se_reference(x3, w1c, w2c)
    assert out3.shape == x3.shape and out3.dtype == x3.dtype
    assert jnp.allclose(out3, ref3, atol=1e-5, rtol=1e-5)

    print("KERNEL_OK")
</pallas_src>

<mosaic_0001>
module attributes {stable_mosaic.version = 11 : i64} {
  func.func @se_fused_kernel(%arg0: i32, %arg1: memref<2x64x256xf32, #tpu.memory_space<vmem>>, %arg2: memref<64x4xf32, #tpu.memory_space<vmem>>, %arg3: memref<4x64xf32, #tpu.memory_space<vmem>>, %arg4: memref<2x64x256xf32, #tpu.memory_space<vmem>>) attributes {dimension_semantics = [#tpu.dimension_semantics<parallel>], iteration_bounds = array<i64: 1>, scalar_prefetch = 0 : i64, scratch_operands = 0 : i64, tpu.core_type = #tpu.core_type<tc>, window_params = [{transform_indices = @transform_0, window_bounds = array<i64: 2, 64, 256>}, {pipeline_mode = #tpu.pipeline_mode<synchronous>, transform_indices = @transform_1, window_bounds = array<i64: 64, 4>}, {pipeline_mode = #tpu.pipeline_mode<synchronous>, transform_indices = @transform_2, window_bounds = array<i64: 4, 64>}, {transform_indices = @transform_3, window_bounds = array<i64: 2, 64, 256>}]} {
    %c0 = arith.constant 0 : index
    %c0_0 = arith.constant 0 : index
    %c0_1 = arith.constant 0 : index
    %0 = vector.load %arg1[%c0, %c0_0, %c0_1] : memref<2x64x256xf32, #tpu.memory_space<vmem>>, vector<2x64x256xf32>
    %cst = arith.constant dense<0.000000e+00> : vector<2x64xf32>
    %1 = vector.multi_reduction <add>, %0, %cst [2] : vector<2x64x256xf32> to vector<2x64xf32>
    %cst_2 = arith.constant 3.906250e-03 : f32
    %2 = vector.broadcast %cst_2 : f32 to vector<2x64xf32>
    %3 = arith.mulf %1, %2 : vector<2x64xf32>
    %c0_3 = arith.constant 0 : index
    %c0_4 = arith.constant 0 : index
    %4 = vector.load %arg2[%c0_3, %c0_4] : memref<64x4xf32, #tpu.memory_space<vmem>>, vector<64x4xf32>
    %cst_5 = arith.constant dense<0.000000e+00> : vector<2x4xf32>
    %5 = tpu.matmul %3, %4, %cst_5 {dimension_numbers = #tpu.dot_dimension_numbers<[1], [0], [0], [1], [0, 0, 1, 1], [], []>} : vector<2x64xf32>, vector<64x4xf32>, vector<2x4xf32> -> vector<2x4xf32>
    %cst_6 = arith.constant 0.000000e+00 : f32
    %6 = vector.broadcast %cst_6 : f32 to vector<2x4xf32>
    %7 = arith.maximumf %5, %6 : vector<2x4xf32>
    %c0_7 = arith.constant 0 : index
    %c0_8 = arith.constant 0 : index
    %8 = vector.load %arg3[%c0_7, %c0_8] : memref<4x64xf32, #tpu.memory_space<vmem>>, vector<4x64xf32>
    %cst_9 = arith.constant dense<0.000000e+00> : vector<2x64xf32>
    %9 = tpu.matmul %7, %8, %cst_9 {dimension_numbers = #tpu.dot_dimension_numbers<[1], [0], [0], [1], [0, 0, 1, 1], [], []>} : vector<2x4xf32>, vector<4x64xf32>, vector<2x64xf32> -> vector<2x64xf32>
    %10 = arith.negf %9 : vector<2x64xf32>
    %11 = math.exp %10 : vector<2x64xf32>
    %cst_10 = arith.constant 1.000000e+00 : f32
    %12 = vector.broadcast %cst_10 : f32 to vector<2x64xf32>
    %13 = arith.addf %12, %11 : vector<2x64xf32>
    %14 = arith.divf %12, %13 : vector<2x64xf32>
    %15 = vector.shape_cast %14 : vector<2x64xf32> to vector<2x64x1xf32>
    %16 = vector.broadcast %15 : vector<2x64x1xf32> to vector<2x64x256xf32>
    %17 = arith.mulf %0, %16 : vector<2x64x256xf32>
    %c0_11 = arith.constant 0 : index
    %c0_12 = arith.constant 0 : index
    %c0_13 = arith.constant 0 : index
    %18 = vector.load %arg4[%c0_11, %c0_12, %c0_13] : memref<2x64x256xf32, #tpu.memory_space<vmem>>, vector<2x64x256xf32>
    tpu.vector_store %arg4[%c0_11, %c0_12, %c0_13], %17 {strides = array<i32>} : memref<2x64x256xf32, #tpu.memory_space<vmem>>, vector<2x64x256xf32>,
    return
  }
  func.func @transform_0(%arg0: i32) -> (i32, i32, i32) {
    %c0_i32 = arith.constant 0 : i32
    %c0_i32_0 = arith.constant 0 : i32
    %c0_i32_1 = arith.constant 0 : i32
    return %arg0, %c0_i32, %c0_i32_0 : i32, i32, i32
  }
  func.func @transform_1(%arg0: i32) -> (i32, i32) {
    %c0_i32 = arith.constant 0 : i32
    %c0_i32_0 = arith.constant 0 : i32
    %c0_i32_1 = arith.constant 0 : i32
    return %c0_i32, %c0_i32_0 : i32, i32
  }
  func.func @transform_2(%arg0: i32) -> (i32, i32) {
    %c0_i32 = arith.constant 0 : i32
    %c0_i32_0 = arith.constant 0 : i32
    %c0_i32_1 = arith.constant 0 : i32
    return %c0_i32, %c0_i32_0 : i32, i32
  }
  func.func @transform_3(%arg0: i32) -> (i32, i32, i32) {
    %c0_i32 = arith.constant 0 : i32
    %c0_i32_0 = arith.constant 0 : i32
    %c0_i32_1 = arith.constant 0 : i32
    return %arg0, %c0_i32, %c0_i32_0 : i32, i32, i32
  }
}

</mosaic_0001>

<bundles_post_ra>
// kernel: se_layer.1
= control target key start
LH: loop header
LB: loop body
LE: loop exit
PB: predicated region body
PF: predicated region fallthrough
CT: control target
= control target key end

     0   :  { %v572_v48 = vmov 0.0   ;;  %vm573_vm0 = vmmov 0   ;;  %v134_v61 = vlaneseq  ;;  %vm145_vm1 = vcmask 130112   ;;  %s965_s0 = inlined_call_operand.vmem [shape: f32[2,64,256], index: 0, kind: input, shape index: {}]   ;;  %s966_s1 = inlined_call_operand.vmem [shape: f32[64,4], index: 1, kind: input, shape index: {}]   ;;  %s967_s2 = inlined_call_operand.vmem [shape: f32[4,64], index: 2, kind: input, shape index: {}]   ;;  %s968_s3 = inlined_call_operand.vmem [shape: f32[2,64,256], index: 3, kind: output, shape index: {}]  }
   0x1   :  { %v597_v0 = vld [vmem:[%s965_s0 + $0x80] sm:$0xff]  ;;  %v602_v1 = vld [vmem:[%s965_s0 + $0x88] sm:$0xff]  ;;  %v619_v5 = vld [vmem:[%s965_s0 + $0x90] sm:$0xff]  ;;  %542 = vmatprep.subr.mxu0 %v572_v48  ;;  %561 = vmatprep.subr.mxu1 %v572_v48  ;;  %vm152_vm2 = vcmask 195712   ;;  %vm159_vm3 = vcmask 261312   ;;  %vm166_vm4 = vcmask 326912  }
   0x2   :  { %v607_v2 = vld [vmem:[%s965_s0] sm:$0xff]  ;;  %v70_v3 = vadd.f32 %v602_v1, %v597_v0  ;;  %v614_v4 = vld [vmem:[%s965_s0 + $0x8] sm:$0xff]  ;;  %v624_v6 = vld [vmem:[%s965_s0 + $0x98] sm:$0xff]  ;;  %558 = vmatprep.mubr.msk.f32.mxu0 %vm573_vm0, %v572_v48  ;;  %563 = vmatprep.mubr.msk.f32.mxu1 %vm573_vm0, %v572_v48  ;;  %vm173_vm5 = vcmask 392512   ;;  %vm180_vm6 = vcmask 458112   ;;  %vm187_vm7 = vcmask 523712  }
   0x3   :  { %v46_v7 = vadd.f32 %v614_v4, %v607_v2  ;;  %v631_v8 = vld [vmem:[%s965_s0 + $0x10] sm:$0xff]  ;;  %v636_v9 = vld [vmem:[%s965_s0 + $0x18] sm:$0xff]  ;;  %v73_v10 = vadd.f32 %v624_v6, %v619_v5  ;;  %v645_v12 = vld [vmem:[%s965_s0 + $0xa0] sm:$0xff]  ;;  %vm228_vm8 = vcmask 1041409   ;;  %vm230_vm9 = vcmask 523264  }
   0x4   :  { %71 = vadd.xlane.f32.xlu1 %v70_v3  ;;  %v49_v11 = vadd.f32 %v636_v9, %v631_v8  ;;  %v650_v13 = vld [vmem:[%s965_s0 + $0xa8] sm:$0xff]  ;;  %v655_v14 = vld [vmem:[%s965_s0 + $0x20] sm:$0xff]  ;;  %v669_v18 = vld [vmem:[%s965_s0 + $0xb0] sm:$0xff]  ;;  %v135_v3 = vand.u32 127, %v134_v61  ;;  %vm309_vm10 = vcmask 1043456   ;;  %vm305_vm11 = vcmask 31744  }
   0x5   :  { %47 = vadd.xlane.f32.xlu0 %v46_v7  ;;  %v660_v15 = vld [vmem:[%s965_s0 + $0x28] sm:$0xff]  ;;  %v76_v16 = vadd.f32 %v650_v13, %v645_v12  ;;  %v674_v19 = vld [vmem:[%s965_s0 + $0xb8] sm:$0xff]  ;;  %v679_v20 = vld [vmem:[%s965_s0 + $0x30] sm:$0xff] }
   0x6   :  { %v52_v17 = vadd.f32 %v660_v15, %v655_v14  ;;  %976 = vst [vmem:[#allocation2_spill] sm:$0xff] %v674_v19  ;;  %v684_v21 = vld [vmem:[%s965_s0 + $0x38] sm:$0xff]  ;;  %v79_v22 = vadd.f32 %v674_v19, %v669_v18  ;;  %v693_v24 = vld [vmem:[%s965_s0 + $0xc0] sm:$0xff]  ;;  %v698_v25 = vld [vmem:[%s965_s0 + $0xc8] sm:$0xff] }
   0x7   :  { %v55_v23 = vadd.f32 %v684_v21, %v679_v20  ;;  %v703_v26 = vld [vmem:[%s965_s0 + $0x40] sm:$0xff]  ;;  %v708_v27 = vld [vmem:[%s965_s0 + $0x48] sm:$0xff]  ;;  %v82_v28 = vadd.f32 %v698_v25, %v693_v24  ;;  %v717_v30 = vld [vmem:[%s965_s0 + $0xd0] sm:$0xff] }
   0x8   :  { %74 = vadd.xlane.f32.xlu1 %v73_v10  ;;  %v58_v29 = vadd.f32 %v708_v27, %v703_v26  ;;  %977 = vst [vmem:[#allocation3_spill] sm:$0xff] %v717_v30  ;;  %v722_v31 = vld [vmem:[%s965_s0 + $0xd8] sm:$0xff]  ;;  %v727_v32 = vld [vmem:[%s965_s0 + $0x50] sm:$0xff]  ;;  %v741_v36 = vld [vmem:[%s965_s0 + $0xe0] sm:$0xff]  ;;  %v810_v10 = vshrl.u32 %v134_v61, 7 }
   0x9   :  { %50 = vadd.xlane.f32.xlu0 %v49_v11  ;;  %978 = vst [vmem:[#allocation4_spill] sm:$0xff] %v722_v31  ;;  %v732_v33 = vld [vmem:[%s965_s0 + $0x58] sm:$0xff]  ;;  %v85_v34 = vadd.f32 %v722_v31, %v717_v30  ;;  %979 = vst [vmem:[#allocation5_spill] sm:$0xff] %v741_v36  ;;  %v746_v37 = vld [vmem:[%s965_s0 + $0xe8] sm:$0xff] }
   0xa   :  { %v61_v35 = vadd.f32 %v732_v33, %v727_v32  ;;  %980 = vst [vmem:[#allocation6_spill] sm:$0xff] %v746_v37  ;;  %v751_v38 = vld [vmem:[%s965_s0 + $0x60] sm:$0xff]  ;;  %v756_v39 = vld [vmem:[%s965_s0 + $0x68] sm:$0xff]  ;;  %v88_v40 = vadd.f32 %v746_v37, %v741_v36  ;;  %v765_v42 = vld [vmem:[%s965_s0 + $0xf0] sm:$0xff] }
   0xb   :  { %v64_v41 = vadd.f32 %v756_v39, %v751_v38  ;;  %981 = vst [vmem:[#allocation7_spill] sm:$0xff] %v765_v42  ;;  %v770_v43 = vld [vmem:[%s965_s0 + $0xf8] sm:$0xff]  ;;  %v775_v44 = vld [vmem:[%s965_s0 + $0x70] sm:$0xff]  ;;  %v115_v51 = vld [vmem:[%s966_s1 + $0x28] sm:$0xff] }
   0xc   :  { %77 = vadd.xlane.f32.xlu1 %v76_v16  ;;  %982 = vst [vmem:[#allocation8_spill] sm:$0xff] %v770_v43  ;;  %v780_v45 = vld [vmem:[%s965_s0 + $0x78] sm:$0xff]  ;;  %v91_v46 = vadd.f32 %v770_v43, %v765_v42  ;;  %v116_v50 = vld [vmem:[%s966_s1 + $0x30] sm:$0xff]  ;;  %v114_v52 = vld [vmem:[%s966_s1 + $0x20] sm:$0xff]  ;;  %v140_v16 = vadd.s32 4294967288, %v135_v3 }
   0xd   :  { %53 = vadd.xlane.f32.xlu0 %v52_v17  ;;  %v67_v47 = vadd.f32 %v780_v45, %v775_v44  ;;  %v117_v49 = vld [vmem:[%s966_s1 + $0x38] sm:$0xff]  ;;  %v112_v54 = vld [vmem:[%s966_s1 + $0x10] sm:$0xff]  ;;  %v111_v55 = vld [vmem:[%s966_s1 + $0x8] sm:$0xff]  ;;  %v147_v17 = vadd.s32 4294967280, %v135_v3 }
   0xe   :  { %543 = vmatpush3.msra.mxu0 %v117_v49  ;;  %v113_v53 = vld [vmem:[%s966_s1 + $0x18] sm:$0xff]  ;;  %v110_v56 = vld [vmem:[%s966_s1] sm:$0xff] }
   0xf   :  { %544 = vmatprep.subr.mxu0 %v572_v48 }
  0x10   :  { %80 = vadd.xlane.f32.xlu1 %v79_v22  ;;  %545 = vmatpush3.msra.mxu0 %v116_v50  ;;  %v154_v22 = vadd.s32 4294967272, %v135_v3 }
  0x11   :  { %56 = vadd.xlane.f32.xlu0 %v55_v23  ;;  %546 = vmatprep.subr.mxu0 %v572_v48  ;;  %v161_v23 = vadd.s32 4294967264, %v135_v3 }
  0x12   :  { %547 = vmatpush3.msra.mxu0 %v115_v51 }
  0x13   :  { %548 = vmatprep.subr.mxu0 %v572_v48  ;;  %v164_v49 = vsub.s32 %v161_v23, %v810_v10  ;;  %v182_v23 = vadd.s32 4294967240, %v135_v3 }
  0x14   :  { %83 = vadd.xlane.f32.xlu1 %v82_v28  ;;  %549 = vmatpush3.msra.mxu0 %v114_v52 }
  0x15   :  { %59 = vadd.xlane.f32.xlu0 %v58_v29  ;;  %550 = vmatprep.subr.mxu0 %v572_v48  ;;  %v168_v29 = vadd.s32 4294967256, %v135_v3 }
  0x16   :  { %551 = vmatpush3.msra.mxu0 %v113_v53 }
  0x17   :  { %552 = vmatprep.subr.mxu0 %v572_v48  ;;  %v171_v52 = vsub.s32 %v168_v29, %v810_v10 }
  0x18   :  { %86 = vadd.xlane.f32.xlu1 %v85_v34  ;;  %553 = vmatpush3.msra.mxu0 %v112_v54  ;;  %v138_v34 = vsub.s32 %v135_v3, %v810_v10 }
  0x19   :  { %62 = vadd.xlane.f32.xlu0 %v61_v35  ;;  %554 = vmatprep.subr.mxu0 %v572_v48 }
  0x1a   :  { %555 = vmatpush3.msra.mxu0 %v111_v55 }
  0x1b   :  { %556 = vmatprep.subr.mxu0 %v572_v48  ;;  %v157_v48 = vsub.s32 %v154_v22, %v810_v10 }
  0x1c   :  { %89 = vadd.xlane.f32.xlu1 %v88_v40  ;;  %557 = vmatpush3.msra.mxu0 %v110_v56  ;;  %v143_v40 = vsub.s32 %v140_v16, %v810_v10 }
  0x1d   :  { %65 = vadd.xlane.f32.xlu0 %v64_v41  ;;  %v150_v41 = vsub.s32 %v147_v17, %v810_v10 }
  0x20   :  { %92 = vadd.xlane.f32.xlu1 %v91_v46  ;;  %v175_v46 = vadd.s32 4294967248, %v135_v3  ;;  %v185_v3 = vsub.s32 %v182_v23, %v810_v10 }
  0x21   :  { %68 = vadd.xlane.f32.xlu0 %v67_v47 }
  0x8d   :  { %v72_v57 = vpop.xlane.xlu1 %71 }
  0x8e   :  { %v48_v58 = vpop.xlane.xlu0 %47  ;;  %v102_v54 = vmul.f32 0.00390625, %v72_v57 }
  0x8f   :  { %v94_v16 = vmul.f32 0.00390625, %v48_v58 }
  0x90   :  { %v192_v37 = vrot.slane %v102_v54, %v138_v34 }
  0x91   :  { %v75_v59 = vpop.xlane.xlu1 %74  ;;  %v139_v19 = vrot.slane %v94_v16, %v138_v34 }
  0x92   :  { %v51_v60 = vpop.xlane.xlu0 %50  ;;  %v103_v47 = vmul.f32 0.00390625, %v75_v59  ;;  %v178_v59 = vsub.s32 %v175_v46, %v810_v10 }
  0x93   :  { %v95_v50 = vmul.f32 0.00390625, %v51_v60 }
  0x94   :  { %v196_v22 = vrot.slane %v103_v47, %v143_v40 }
  0x95   :  { %v78_v62 = vpop.xlane.xlu1 %77  ;;  %v144_v60 = vrot.slane %v95_v50, %v143_v40 }
  0x96   :  { %v54_v63 = vpop.xlane.xlu0 %53  ;;  %v104_v51 = vmul.f32 0.00390625, %v78_v62  ;;  %v197_v46 = vsel %vm145_vm1, %v196_v22, %v192_v37  ;;  %v304_v22 = vld [vmem:[%s967_s2] sm:$0xf] }
  0x97   :  { %v96_v55 = vmul.f32 0.00390625, %v54_v63  ;;  %v146_v40 = vsel %vm145_vm1, %v144_v60, %v139_v19  ;;  %562 = vmatpush3.msk.msra.mxu1 %vm309_vm10, %v304_v22 }
  0x98   :  { %v201_v62 = vrot.slane %v104_v51, %v150_v41 }
  0x99   :  { %v81_v7 = vpop.xlane.xlu1 %80  ;;  %v151_v57 = vrot.slane %v96_v55, %v150_v41 }
  0x9a   :  { %v57_v11 = vpop.xlane.xlu0 %56  ;;  %v105_v56 = vmul.f32 0.00390625, %v81_v7  ;;  %v202_v50 = vsel %vm152_vm2, %v201_v62, %v197_v46 }
  0x9b   :  { %v97_v17 = vmul.f32 0.00390625, %v57_v11  ;;  %v153_v54 = vsel %vm152_vm2, %v151_v57, %v146_v40 }
  0x9c   :  { %v206_v63 = vrot.slane %v105_v56, %v157_v48 }
  0x9d   :  { %v84_v28 = vpop.xlane.xlu1 %83  ;;  %v158_v58 = vrot.slane %v97_v17, %v157_v48 }
  0x9e   :  { %v60_v35 = vpop.xlane.xlu0 %59  ;;  %v106_v43 = vmul.f32 0.00390625, %v84_v28  ;;  %v207_v34 = vsel %vm159_vm3, %v206_v63, %v202_v50 }
  0x9f   :  { %v98_v42 = vmul.f32 0.00390625, %v60_v35  ;;  %v160_v37 = vsel %vm159_vm3, %v158_v58, %v153_v54 }
  0xa0   :  { %v211_v11 = vrot.slane %v106_v43, %v164_v49 }
  0xa1   :  { %v87_v53 = vpop.xlane.xlu1 %86  ;;  %v165_v47 = vrot.slane %v98_v42, %v164_v49 }
  0xa2   :  { %v63_v61 = vpop.xlane.xlu0 %62  ;;  %v107_v31 = vmul.f32 0.00390625, %v87_v53 }
  0xa3   :  { %v99_v30 = vmul.f32 0.00390625, %v63_v61  ;;  %v167_v19 = vsel %vm166_vm4, %v165_v47, %v160_v37  ;;  %v426_v47 = vsub.s32 1, %v810_v10 }
  0xa4   :  { %v216_v35 = vrot.slane %v107_v31, %v171_v52  ;;  %v212_v31 = vsel %vm166_vm4, %v211_v11, %v207_v34  ;;  %v391_v11 = vsub.s32 0, %v810_v10 }
  0xa5   :  { %v90_v29 = vpop.xlane.xlu1 %89  ;;  %v172_v51 = vrot.slane %v99_v30, %v171_v52 }
  0xa6   :  { %v108_v7 = vmul.f32 0.00390625, %v90_v29  ;;  %v66_v36 = vpop.xlane.xlu0 %65  ;;  %v217_v49 = vsel %vm173_vm5, %v216_v35, %v212_v31 }
  0xa7   :  { %v100_v28 = vmul.f32 0.00390625, %v66_v36  ;;  %v174_v52 = vsel %vm173_vm5, %v172_v51, %v167_v19 }
  0xa8   :  { %v221_v53 = vrot.slane %v108_v7, %v178_v59 }
  0xa9   :  { %v93_v41 = vpop.xlane.xlu1 %92  ;;  %v179_v48 = vrot.slane %v100_v28, %v178_v59 }
  0xaa   :  { %v109_v43 = vmul.f32 0.00390625, %v93_v41  ;;  %v69_v36 = vpop.xlane.xlu0 %68  ;;  %v222_v55 = vsel %vm180_vm6, %v221_v53, %v217_v49 }
  0xab   :  { %v101_v42 = vmul.f32 0.00390625, %v69_v36  ;;  %v181_v61 = vsel %vm180_vm6, %v179_v48, %v174_v52 }
  0xac   :  { %v226_v30 = vrot.slane %v109_v43, %v185_v3 }
  0xad   :  { %v186_v56 = vrot.slane %v101_v42, %v185_v3 }
  0xae   :  { %v227_v16 = vsel %vm187_vm7, %v226_v30, %v222_v55  ;;  %v984_v30 = vld [vmem:[#allocation5_spill] sm:$0xff]  ;;  %v985_v55 = vld [vmem:[#allocation6_spill] sm:$0xff] }
  0xaf   :  { %v188_v17 = vsel %vm187_vm7, %v186_v56, %v181_v61  ;;  %v986_v61 = vld [vmem:[#allocation3_spill] sm:$0xff] }
  0xb0   :  { %v229_v59 = vsel %vm228_vm8, %v227_v16, %v188_v17  ;;  %v987_v17 = vld [vmem:[#allocation4_spill] sm:$0xff] }
  0xb1   :  { %559 = vmatmul.mubr.msk.f32.vlgmr.msra.gmra.mxu0 %vm230_vm9, %v229_v59 }
 0x171   :  { %v299_v23 = vpop.f32.mrf.mxu0 }
 0x172   :  { %v303_v60 = vmax.f32 %v299_v23, 0.0  ;;  %v988_v23 = vld [vmem:[#allocation7_spill] sm:$0xff] }
 0x173   :  { %v560_v62 = vpop.f32.mrf.mxu0 }
 0x174   :  { %564 = vmatmul.mubr.msk.f32.vlgmr.msra.gmra.mxu1 %vm305_vm11, %v303_v60  ;;  %v989_v62 = vld [vmem:[#allocation8_spill] sm:$0xff] }
 0x234   :  { %v379_v29 = vpop.f32.mrf.mxu1 }
 0x235   :  { %v530_v57 = vmul.f32 -1.442695, %v379_v29 }
 0x236   :  { %v565_v63 = vpop.f32.mrf.mxu1 }
 0x237   :  { %568 = vpow2.f32 %v530_v57 }
 0x244   :  { %v569_v7 = vpop.eup %568 }
 0x245   :  { %v386_v58 = vadd.f32 1.0, %v569_v7 }
 0x247   :  { %570 = vrcp.f32 %v386_v58 }
 0x254   :  { %v571_v28 = vpop.eup %570 }
 0x255   :  { %v392_v46 = vrot.slane %v571_v28, %v391_v11  ;;  %v427_v35 = vrot.slane %v571_v28, %v426_v47 }
 0x257   :  { %398 = vbcast.lane.b32.xlu1 %v392_v46, 264  ;;  %394 = vbcast.lane.b32.xlu0 %v392_v46, 256 }
 0x25b   :  { %402 = vbcast.lane.b32.xlu1 %v392_v46, 272  ;;  %410 = vbcast.lane.b32.xlu0 %v392_v46, 288 }
 0x25f   :  { %406 = vbcast.lane.b32.xlu1 %v392_v46, 280  ;;  %418 = vbcast.lane.b32.xlu0 %v392_v46, 304 }
 0x263   :  { %414 = vbcast.lane.b32.xlu1 %v392_v46, 296  ;;  %429 = vbcast.lane.b32.xlu0 %v427_v35, 256 }
 0x267   :  { %422 = vbcast.lane.b32.xlu1 %v392_v46, 312  ;;  %437 = vbcast.lane.b32.xlu0 %v427_v35, 272 }
 0x26b   :  { %433 = vbcast.lane.b32.xlu1 %v427_v35, 264  ;;  %445 = vbcast.lane.b32.xlu0 %v427_v35, 288 }
 0x26f   :  { %441 = vbcast.lane.b32.xlu1 %v427_v35, 280  ;;  %453 = vbcast.lane.b32.xlu0 %v427_v35, 304 }
 0x273   :  { %449 = vbcast.lane.b32.xlu1 %v427_v35, 296 }
 0x277   :  { %457 = vbcast.lane.b32.xlu1 %v427_v35, 312 }
 0x2c9   :  { %v399_v3 = vpop.permute.xlu1 %398  ;;  %v395_v40 = vpop.permute.xlu0 %394 }
 0x2ca   :  { %v461_v50 = vmul.f32 %v399_v3, %v631_v8  ;;  %v462_v51 = vmul.f32 %v399_v3, %v636_v9  ;;  %v459_v10 = vmul.f32 %v395_v40, %v607_v2  ;;  %v460_v53 = vmul.f32 %v395_v40, %v614_v4 }
 0x2cc   :  { %493 = vst [vmem:[%s968_s3 + $0x10] sm:$0xff] %v461_v50  ;;  %494 = vst [vmem:[%s968_s3 + $0x18] sm:$0xff] %v462_v51 }
 0x2cd   :  { %491 = vst [vmem:[%s968_s3] sm:$0xff] %v459_v10  ;;  %492 = vst [vmem:[%s968_s3 + $0x8] sm:$0xff] %v460_v53  ;;  %v403_v8 = vpop.permute.xlu1 %402  ;;  %v411_v2 = vpop.permute.xlu0 %410 }
 0x2ce   :  { %v463_v4 = vmul.f32 %v403_v8, %v655_v14  ;;  %v464_v9 = vmul.f32 %v403_v8, %v660_v15  ;;  %v467_v41 = vmul.f32 %v411_v2, %v703_v26  ;;  %v468_v54 = vmul.f32 %v411_v2, %v708_v27 }
 0x2d0   :  { %495 = vst [vmem:[%s968_s3 + $0x20] sm:$0xff] %v463_v4  ;;  %496 = vst [vmem:[%s968_s3 + $0x28] sm:$0xff] %v464_v9 }
 0x2d1   :  { %499 = vst [vmem:[%s968_s3 + $0x40] sm:$0xff] %v467_v41  ;;  %500 = vst [vmem:[%s968_s3 + $0x48] sm:$0xff] %v468_v54  ;;  %v407_v14 = vpop.permute.xlu1 %406  ;;  %v419_v15 = vpop.permute.xlu0 %418 }
 0x2d2   :  { %v465_v26 = vmul.f32 %v407_v14, %v679_v20  ;;  %v466_v27 = vmul.f32 %v407_v14, %v684_v21  ;;  %v471_v34 = vmul.f32 %v419_v15, %v751_v38  ;;  %v472_v48 = vmul.f32 %v419_v15, %v756_v39 }
 0x2d4   :  { %497 = vst [vmem:[%s968_s3 + $0x30] sm:$0xff] %v465_v26  ;;  %498 = vst [vmem:[%s968_s3 + $0x38] sm:$0xff] %v466_v27 }
 0x2d5   :  { %503 = vst [vmem:[%s968_s3 + $0x60] sm:$0xff] %v471_v34  ;;  %504 = vst [vmem:[%s968_s3 + $0x68] sm:$0xff] %v472_v48  ;;  %v415_v20 = vpop.permute.xlu1 %414  ;;  %v430_v21 = vpop.permute.xlu0 %429 }
 0x2d6   :  { %v469_v38 = vmul.f32 %v415_v20, %v727_v32  ;;  %v470_v39 = vmul.f32 %v415_v20, %v732_v33  ;;  %v475_v43 = vmul.f32 %v430_v21, %v597_v0  ;;  %v476_v36 = vmul.f32 %v430_v21, %v602_v1 }
 0x2d8   :  { %501 = vst [vmem:[%s968_s3 + $0x50] sm:$0xff] %v469_v38  ;;  %502 = vst [vmem:[%s968_s3 + $0x58] sm:$0xff] %v470_v39 }
 0x2d9   :  { %507 = vst [vmem:[%s968_s3 + $0x80] sm:$0xff] %v475_v43  ;;  %508 = vst [vmem:[%s968_s3 + $0x88] sm:$0xff] %v476_v36  ;;  %v423_v32 = vpop.permute.xlu1 %422  ;;  %v438_v0 = vpop.permute.xlu0 %437 }
 0x2da   :  { %v473_v1 = vmul.f32 %v423_v32, %v775_v44  ;;  %v474_v33 = vmul.f32 %v423_v32, %v780_v45  ;;  %v479_v37 = vmul.f32 %v438_v0, %v645_v12  ;;  %v480_v31 = vmul.f32 %v438_v0, %v650_v13 }
 0x2dc   :  { %505 = vst [vmem:[%s968_s3 + $0x70] sm:$0xff] %v473_v1  ;;  %506 = vst [vmem:[%s968_s3 + $0x78] sm:$0xff] %v474_v33 }
 0x2dd   :  { %511 = vst [vmem:[%s968_s3 + $0xa0] sm:$0xff] %v479_v37  ;;  %512 = vst [vmem:[%s968_s3 + $0xa8] sm:$0xff] %v480_v31  ;;  %v434_v44 = vpop.permute.xlu1 %433  ;;  %v446_v12 = vpop.permute.xlu0 %445 }
 0x2de   :  { %v477_v13 = vmul.f32 %v434_v44, %v619_v5  ;;  %v478_v45 = vmul.f32 %v434_v44, %v624_v6  ;;  %v483_v42 = vmul.f32 %v446_v12, %v693_v24  ;;  %v484_v19 = vmul.f32 %v446_v12, %v698_v25  ;;  %v983_v25 = vld [vmem:[#allocation2_spill] sm:$0xff] }
 0x2e0   :  { %509 = vst [vmem:[%s968_s3 + $0x90] sm:$0xff] %v477_v13  ;;  %510 = vst [vmem:[%s968_s3 + $0x98] sm:$0xff] %v478_v45 }
 0x2e1   :  { %515 = vst [vmem:[%s968_s3 + $0xc0] sm:$0xff] %v483_v42  ;;  %516 = vst [vmem:[%s968_s3 + $0xc8] sm:$0xff] %v484_v19  ;;  %v442_v5 = vpop.permute.xlu1 %441  ;;  %v454_v6 = vpop.permute.xlu0 %453 }
 0x2e2   :  { %v481_v24 = vmul.f32 %v442_v5, %v669_v18  ;;  %v482_v49 = vmul.f32 %v442_v5, %v983_v25  ;;  %v487_v52 = vmul.f32 %v454_v6, %v984_v30  ;;  %v488_v56 = vmul.f32 %v454_v6, %v985_v55 }
 0x2e4   :  { %513 = vst [vmem:[%s968_s3 + $0xb0] sm:$0xff] %v481_v24  ;;  %514 = vst [vmem:[%s968_s3 + $0xb8] sm:$0xff] %v482_v49 }
 0x2e5   :  { %519 = vst [vmem:[%s968_s3 + $0xe0] sm:$0xff] %v487_v52  ;;  %520 = vst [vmem:[%s968_s3 + $0xe8] sm:$0xff] %v488_v56  ;;  %v450_v18 = vpop.permute.xlu1 %449 }
 0x2e6   :  { %v485_v16 = vmul.f32 %v450_v18, %v986_v61  ;;  %v486_v59 = vmul.f32 %v450_v18, %v987_v17 }
 0x2e8   :  { %517 = vst [vmem:[%s968_s3 + $0xd0] sm:$0xff] %v485_v16  ;;  %518 = vst [vmem:[%s968_s3 + $0xd8] sm:$0xff] %v486_v59 }
 0x2e9   :  { %v458_v22 = vpop.permute.xlu1 %457 }
 0x2ea   :  { %v489_v60 = vmul.f32 %v458_v22, %v988_v23  ;;  %v490_v29 = vmul.f32 %v458_v22, %v989_v62 }
 0x2ec   :  { %521 = vst [vmem:[%s968_s3 + $0xf0] sm:$0xff] %v489_v60  ;;  %522 = vst [vmem:[%s968_s3 + $0xf8] sm:$0xff] %v490_v29 }

</bundles_post_ra>
